<compile_context>
chip_gen: v7x
topology: tpu7x:2x2x1
jax: 0.10.0
libtpu: 0.0.40
codegen_flags: <defaults>
</compile_context>

<pallas_src>
import jax
import jax.numpy as jnp
from jax.experimental import pallas as pl
from jax.experimental.pallas import tpu as pltpu


# ------------------------------ Pallas kernels ------------------------------ #
def _gate_mlp_kernel(meta_ref, w1_ref, b1_ref, w2_ref, b2_ref, gate_ref):
    """gate = sigmoid(relu(meta @ W1 + b1) @ W2 + b2)   -- single grid step."""
    h = jnp.dot(meta_ref[...], w1_ref[...], preferred_element_type=jnp.float32)
    h = jnp.maximum(h + b1_ref[...], 0.0)
    g = jnp.dot(h, w2_ref[...], preferred_element_type=jnp.float32)
    gate_ref[...] = jax.nn.sigmoid(g + b2_ref[...])


def _gate_apply_kernel(gate_ref, feat_ref, out_ref):
    """out = feat * gate, gate is a per-row (batch*channel) scalar column."""
    out_ref[...] = (feat_ref[...] * gate_ref[...]).astype(out_ref.dtype)


# ------------------------------ tile selection ------------------------------ #
def _largest_dividing_tile(extent, quantum, limit):
    """Largest multiple of `quantum` that divides `extent` and is <= limit."""
    if extent % quantum != 0:
        return None
    limit = min(int(limit), extent)
    limit -= limit % quantum
    for t in range(limit, 0, -quantum):
        if extent % t == 0:
            return t
    return None


def _pick_tiles(n_rows, n_cols, itemsize, target_bytes):
    """Pick (tile_r, tile_s) so one buffer is ~target_bytes and tiling is legal."""
    # Lane (last) dim: keep full extent unless even an 8-row slab exceeds target.
    tile_s = n_cols
    if 8 * n_cols * itemsize > target_bytes:
        cand = _largest_dividing_tile(
            n_cols, 128, max(128, target_bytes // (8 * itemsize)))
        if cand:
            tile_s = cand
    # Sublane (second-to-last) dim: multiple of 8 dividing n_rows, else full.
    row_bytes = tile_s * itemsize
    tile_r = n_rows
    if n_rows * row_bytes > target_bytes:
        cand = _largest_dividing_tile(n_rows, 8, max(8, target_bytes // row_bytes))
        if cand:
            tile_r = cand
    return tile_r, tile_s


# --------------------------------- wrapper ---------------------------------- #
def meta_net_forward(feat_maps, metadata, w1, b1, w2, b2, *,
                     target_block_bytes=1 << 20):
    """feat_maps: (B, C, H, W); metadata: (B, M); weights stored as (in, out)."""
    B, C, H, W = feat_maps.shape
    M = metadata.shape[1]
    Hd = w1.shape[1]
    S = H * W
    R = B * C

    meta = metadata.astype(jnp.float32)              # mirrors .float() in torch
    w1f = w1.astype(jnp.float32)
    w2f = w2.astype(jnp.float32)
    b1_2d = b1.reshape(1, Hd).astype(jnp.float32)
    b2_2d = b2.reshape(1, C).astype(jnp.float32)

    # ---- Stage 1: tiny gate MLP, single step, fully VMEM resident ---------- #
    gate = pl.pallas_call(
        _gate_mlp_kernel,
        out_shape=jax.ShapeDtypeStruct((B, C), jnp.float32),
        cost_estimate=pl.CostEstimate(
            flops=2 * B * (M * Hd + Hd * C),
            transcendentals=B * C,
            bytes_accessed=4 * (B * M + M * Hd + Hd + Hd * C + C + B * C)),
    )(meta, w1f, b1_2d, w2f, b2_2d)

    # ---- Stage 2: stream feature maps, apply per-(batch, channel) gate ----- #
    feat2 = feat_maps.reshape(R, S)                  # contiguous -> free reshape
    gate2 = gate.reshape(R, 1)
    itemsize = feat_maps.dtype.itemsize
    tile_r, tile_s = _pick_tiles(R, S, itemsize, target_block_bytes)
    grid = (R // tile_r, S // tile_s)

    out = pl.pallas_call(
        _gate_apply_kernel,
        out_shape=jax.ShapeDtypeStruct((R, S), feat_maps.dtype),
        grid=grid,
        in_specs=[
            pl.BlockSpec((tile_r, 1), lambda i, j: (i, 0)),        # gate column
            pl.BlockSpec((tile_r, tile_s), lambda i, j: (i, j)),   # feature rows
        ],
        out_specs=pl.BlockSpec((tile_r, tile_s), lambda i, j: (i, j)),
        compiler_params=pltpu.CompilerParams(
            dimension_semantics=("parallel", "parallel")),
        cost_estimate=pl.CostEstimate(
            flops=R * S,
            transcendentals=0,
            bytes_accessed=2 * R * S * itemsize + 4 * R * grid[1]),
    )(gate2, feat2)

    return out.reshape(B, C, H, W)


# --------------------------- module-like wrapper ----------------------------- #
class MetaNetPallas:
    """JAX/Pallas equivalent of MetaNet (1x1-conv MLP gate over metadata)."""

    def __init__(self, key, n_feats, n_metadata, hidden=256):
        k1, k2, k3, k4 = jax.random.split(key, 4)
        # 1x1 Conv2d(in, out) on a (B, in, 1, 1) tensor == linear (in -> out);
        # weights stored as (in, out) so the kernels need no transpose.
        self.w1 = jax.random.normal(k1, (n_metadata, hidden), jnp.float32) * 0.1
        self.b1 = jax.random.normal(k2, (hidden,), jnp.float32) * 0.1
        self.w2 = jax.random.normal(k3, (hidden, n_feats), jnp.float32) * 0.1
        self.b2 = jax.random.normal(k4, (n_feats,), jnp.float32) * 0.1

    def __call__(self, feat_maps, metadata, **kw):
        return meta_net_forward(feat_maps, metadata,
                                self.w1, self.b1, self.w2, self.b2, **kw)


# ---------------------------- pure-JAX reference ----------------------------- #
def _reference(mn, feat_maps, metadata):
    h = jnp.maximum(metadata.astype(jnp.float32) @ mn.w1 + mn.b1, 0.0)
    g = jax.nn.sigmoid(h @ mn.w2 + mn.b2)                 # (B, C)
    return feat_maps * g[:, :, None, None]


if __name__ == "__main__":
    key = jax.random.PRNGKey(0)
    k_param, k_feat, k_meta = jax.random.split(key, 3)

    B, C, H, W = 2, 32, 7, 7        # feature maps (n_feats = 32)
    n_metadata, hidden = 8, 32      # small hidden for the example

    feat_maps = jax.random.normal(k_feat, (B, C, H, W), jnp.float32)
    metadata = jax.random.normal(k_meta, (B, n_metadata), jnp.float32)

    mn = MetaNetPallas(k_param, n_feats=C, n_metadata=n_metadata, hidden=hidden)
    ref = _reference(mn, feat_maps, metadata)

    # Default path (toy shapes fit a single ~12.5 KiB block -> 1-step grid).
    out = jax.block_until_ready(mn(feat_maps, metadata))
    assert out.shape == (B, C, H, W), out.shape
    assert jnp.allclose(out, ref, atol=1e-5, rtol=1e-5), \
        float(jnp.max(jnp.abs(out - ref)))

    # Also exercise the tiled multi-step pipelined path (small block target
    # forces a (4, 1) grid at these toy shapes).
    out_tiled = jax.block_until_ready(
        mn(feat_maps, metadata, target_block_bytes=4096))
    assert jnp.allclose(out_tiled, ref, atol=1e-5, rtol=1e-5), \
        float(jnp.max(jnp.abs(out_tiled - ref)))

    print("KERNEL_OK")
</pallas_src>

<mosaic_0001>
module attributes {stable_mosaic.version = 11 : i64} {
  func.func @_gate_mlp_kernel(%arg0: memref<2x8xf32, #tpu.memory_space<vmem>>, %arg1: memref<8x32xf32, #tpu.memory_space<vmem>>, %arg2: memref<1x32xf32, #tpu.memory_space<vmem>>, %arg3: memref<32x32xf32, #tpu.memory_space<vmem>>, %arg4: memref<1x32xf32, #tpu.memory_space<vmem>>, %arg5: memref<2x32xf32, #tpu.memory_space<vmem>>) attributes {dimension_semantics = [], scalar_prefetch = 0 : i64, scratch_operands = 0 : i64, tpu.core_type = #tpu.core_type<tc>} {
    %c0 = arith.constant 0 : index
    %c0_0 = arith.constant 0 : index
    %0 = vector.load %arg0[%c0, %c0_0] : memref<2x8xf32, #tpu.memory_space<vmem>>, vector<2x8xf32>
    %c0_1 = arith.constant 0 : index
    %c0_2 = arith.constant 0 : index
    %1 = vector.load %arg1[%c0_1, %c0_2] : memref<8x32xf32, #tpu.memory_space<vmem>>, vector<8x32xf32>
    %cst = arith.constant dense<0.000000e+00> : vector<2x32xf32>
    %2 = tpu.matmul %0, %1, %cst {dimension_numbers = #tpu.dot_dimension_numbers<[1], [0], [0], [1], [0, 0, 1, 1], [], []>} : vector<2x8xf32>, vector<8x32xf32>, vector<2x32xf32> -> vector<2x32xf32>
    %c0_3 = arith.constant 0 : index
    %c0_4 = arith.constant 0 : index
    %3 = vector.load %arg2[%c0_3, %c0_4] : memref<1x32xf32, #tpu.memory_space<vmem>>, vector<1x32xf32>
    %4 = vector.broadcast %3 : vector<1x32xf32> to vector<2x32xf32>
    %5 = arith.addf %2, %4 : vector<2x32xf32>
    %cst_5 = arith.constant 0.000000e+00 : f32
    %6 = vector.broadcast %cst_5 : f32 to vector<2x32xf32>
    %7 = arith.maximumf %5, %6 : vector<2x32xf32>
    %c0_6 = arith.constant 0 : index
    %c0_7 = arith.constant 0 : index
    %8 = vector.load %arg3[%c0_6, %c0_7] : memref<32x32xf32, #tpu.memory_space<vmem>>, vector<32x32xf32>
    %cst_8 = arith.constant dense<0.000000e+00> : vector<2x32xf32>
    %9 = tpu.matmul %7, %8, %cst_8 {dimension_numbers = #tpu.dot_dimension_numbers<[1], [0], [0], [1], [0, 0, 1, 1], [], []>} : vector<2x32xf32>, vector<32x32xf32>, vector<2x32xf32> -> vector<2x32xf32>
    %c0_9 = arith.constant 0 : index
    %c0_10 = arith.constant 0 : index
    %10 = vector.load %arg4[%c0_9, %c0_10] : memref<1x32xf32, #tpu.memory_space<vmem>>, vector<1x32xf32>
    %11 = vector.broadcast %10 : vector<1x32xf32> to vector<2x32xf32>
    %12 = arith.addf %9, %11 : vector<2x32xf32>
    %13 = arith.negf %12 : vector<2x32xf32>
    %14 = math.exp %13 : vector<2x32xf32>
    %cst_11 = arith.constant 1.000000e+00 : f32
    %15 = vector.broadcast %cst_11 : f32 to vector<2x32xf32>
    %16 = arith.addf %15, %14 : vector<2x32xf32>
    %17 = arith.divf %15, %16 : vector<2x32xf32>
    %c0_12 = arith.constant 0 : index
    %c0_13 = arith.constant 0 : index
    %18 = vector.load %arg5[%c0_12, %c0_13] : memref<2x32xf32, #tpu.memory_space<vmem>>, vector<2x32xf32>
    tpu.vector_store %arg5[%c0_12, %c0_13], %17 {strides = array<i32>} : memref<2x32xf32, #tpu.memory_space<vmem>>, vector<2x32xf32>,
    return
  }
}

</mosaic_0001>

<bundles_post_ra>
// kernel: tpu_custom_call.1
= control target key start
LH: loop header
LB: loop body
LE: loop exit
PB: predicated region body
PF: predicated region fallthrough
CT: control target
= control target key end

     0   :  { %10 = vsyncpa [#allocation3], 0  ;;  %s485_s0 = inlined_call_operand.hbm [shape: f32[2,8], index: 0, kind: input, shape index: {}]   ;;  %s486_s1 = inlined_call_operand.hbm [shape: f32[8,32], index: 1, kind: input, shape index: {}]   ;;  %s487_s2 = inlined_call_operand.vmem [shape: f32[1,32], index: 2, kind: input, shape index: {}]   ;;  %s488_s3 = inlined_call_operand.hbm [shape: f32[32,32], index: 3, kind: input, shape index: {}]   ;;  %s489_s4 = inlined_call_operand.vmem [shape: f32[1,32], index: 4, kind: input, shape index: {}]   ;;  %s490_s5 = inlined_call_operand.hbm [shape: f32[2,32], index: 5, kind: output, shape index: {}]  }
   0x1   :  { %11 = vsyncpa [#allocation6], 0 }
   0x2   :  { %12 = vsyncpa [#allocation4], 0  ;;  %s392_s18 = smov [#allocation5]   ;;  %s393_s20 = smov [#allocation2]  }
   0x3   :  { %s29_s19 = sshll.u32 %s392_s18, 4  ;;  %s19_s21 = sshll.u32 %s393_s20, 4  ;;  %s30_s19 = int_to_ptr.vmem [resolvable:$true] %s29_s19  ;;  %s20_s21 = int_to_ptr.vmem [resolvable:$true] %s19_s21 }
   0x4   :  { %s298_s24 = scalar_lea.hbm %s486_s1, 128 }
   0x5   :  { %p299_p0 = scmp.ne.s32.totalorder %s486_s1, %s298_s24  ;;  %p302_p1 = scmp.lt.u32.totalorder %s298_s24, %s486_s1 }
   0x7   :  { %p304_p2 = pnand %p302_p1, %p299_p0 }
   0x9   :  { %307 = shalt.err (!%p304_p2)
}
   0xa   :  { %s308_s29 = scalar_lea.vmem %s30_s19, 128  ;;  %p313_p4 = scmp.lt.s32.totalorder %s30_s19, %s30_s19 }
   0xb   :  { %p309_p3 = scmp.ne.s32.totalorder %s30_s19, %s308_s29  ;;  %p314_p5 = scmp.lt.s32.totalorder %s308_s29, %s308_s29 }
   0xd   :  { %p315_p6 = por %p314_p5, %p313_p4 }
   0xf   :  { %p316_p7 = pnand %p315_p6, %p309_p3 }
  0x11   :  { %319 = shalt.err (!%p316_p7)
}
  0x12   :  { %32 = dma.hbm_to_vmem [thread:$0]  %s486_s1, 128, %s30_s19, [#allocation6]  }
  0x13   :  { %s320_s9 = scalar_lea.hbm %s485_s0, 32 }
  0x14   :  { %p321_p8 = scmp.ne.s32.totalorder %s485_s0, %s320_s9  ;;  %p324_p9 = scmp.lt.u32.totalorder %s320_s9, %s485_s0 }
  0x16   :  { %p326_p10 = pnand %p324_p9, %p321_p8 }
  0x18   :  { %329 = shalt.err (!%p326_p10)
}
  0x19   :  { %s330_s14 = scalar_lea.vmem %s20_s21, 32  ;;  %p335_p12 = scmp.lt.s32.totalorder %s20_s21, %s20_s21 }
  0x1a   :  { %p331_p11 = scmp.ne.s32.totalorder %s20_s21, %s330_s14  ;;  %p336_p13 = scmp.lt.s32.totalorder %s330_s14, %s330_s14 }
  0x1c   :  { %p337_p0 = por %p336_p13, %p335_p12 }
  0x1e   :  { %p338_p1 = pnand %p337_p0, %p331_p11 }
  0x20   :  { %341 = shalt.err (!%p338_p1)
}
  0x21   :  { %22 = dma.hbm_to_vmem [thread:$0]  %s485_s0, 32, %s20_s21, [#allocation3]  }
  0x22   :  { %s394_s16 = smov [#allocation7]   ;;  %s342_s20 = scalar_lea.hbm %s488_s3, 512 }
  0x23   :  { %s40_s17 = sshll.u32 %s394_s16, 4  ;;  %p343_p2 = scmp.ne.s32.totalorder %s488_s3, %s342_s20  ;;  %s41_s17 = int_to_ptr.vmem [resolvable:$true] %s40_s17 }
  0x24   :  { %p346_p3 = scmp.lt.u32.totalorder %s342_s20, %s488_s3 }
  0x26   :  { %p348_p4 = pnand %p346_p3, %p343_p2 }
  0x28   :  { %351 = shalt.err (!%p348_p4)
}
  0x29   :  { %s352_s26 = scalar_lea.vmem %s41_s17, 512  ;;  %p357_p6 = scmp.lt.s32.totalorder %s41_s17, %s41_s17 }
  0x2a   :  { %p353_p5 = scmp.ne.s32.totalorder %s41_s17, %s352_s26  ;;  %p358_p7 = scmp.lt.s32.totalorder %s352_s26, %s352_s26 }
  0x2c   :  { %p359_p8 = por %p358_p7, %p357_p6 }
  0x2e   :  { %p360_p9 = pnand %p359_p8, %p353_p5 }
  0x30   :  { %363 = shalt.err (!%p360_p9)
}
  0x31   :  { %s395_s0 = smov 128   ;;  %s396_s21 = smov 8  }
  0x32   :  { %46 = dma.hbm_to_vmem [thread:$0]  %s488_s3, 512, %s41_s17, [#allocation6], %s395_s0, %s395_s0, %s396_s21  }
  0x33   :  { %386 = dma.done.wait [#allocation3], 32  }
  0x34   :  { %387 = vsyncadd [#allocation3], 4294967264 }
  0x35   :  { %388 = dma.done.wait [#allocation6], 640  }
  0x36   :  { %389 = vsyncadd [#allocation6], 4294966656  ;;  %v397_v0 = vmov 0.0   ;;  %vm398_vm0 = vmmov 0   ;;  %v399_v1 = vmov 0.0|0.0   ;;  %vm67_vm1 = vcmask 64512  }
  0x37   :  { %263 = vmatprep.subr.mxu0 %v397_v0  ;;  %265 = vmatprep.mubr.msk.f32.mxu0 %vm398_vm0, %v397_v0  ;;  %v59_v2 = vld [vmem:[#allocation5] sm:$0xff]  ;;  %v58_v3 = vld [vmem:[#allocation2] sm:$0x3]  ;;  %v142_v4 = vld [vmem:[#allocation7] sm:$0xff]  ;;  %vm153_vm2 = vcmask 261120   ;;  %s400_s7 = smov [#allocation8]  }
  0x38   :  { %279 = vmatprep.subr.bf16.mxu1 %v399_v1  ;;  %276 = vmatprep.mubr.msk.f32.mxu1 %vm398_vm0, %v397_v0  ;;  %v143_v5 = vld [vmem:[#allocation7 + $0x8] sm:$0xff]  ;;  %v144_v7 = vld [vmem:[#allocation7 + $0x10] sm:$0xff]  ;;  %v145_v8 = vld [vmem:[#allocation7 + $0x18] sm:$0xff]  ;;  %vm233_vm3 = vcmask 254976  }
  0x39   :  { %264 = vmatpush3.msra.mxu0 %v59_v2  ;;  %v280_v6 = vpack.c.bf16 %v143_v5, %v142_v4  ;;  %v283_v9 = vpack.c.bf16 %v145_v8, %v144_v7  ;;  %v251_v10 = vld [vmem:[%s487_s2] ss:$0 sm:$0xff]  ;;  %s241_s2 = sshll.u32 %s400_s7, 4  ;;  %s242_s2 = int_to_ptr.vmem [resolvable:$true] %s241_s2 }
  0x3a   :  { %266 = vmatmul.mubr.msk.f32.vlgmr.msra.gmra.mrb[0].mxu0 %vm67_vm1, %v58_v3  ;;  %v253_v15 = vld [vmem:[%s489_s4] ss:$0 sm:$0xff]  ;;  %s364_s8 = scalar_lea.vmem %s242_s2, 32  ;;  %p369_p11 = scmp.lt.s32.totalorder %s242_s2, %s242_s2 }
  0x3b   :  { %281 = vmatpush3.bf16.msra.mxu1 %v280_v6  ;;  %p365_p10 = scmp.ne.s32.totalorder %s242_s2, %s364_s8  ;;  %p370_p12 = scmp.lt.s32.totalorder %s364_s8, %s364_s8 }
  0x3c   :  { %282 = vmatprep.subr.bf16.mxu1 %v399_v1 }
  0x3d   :  { %p371_p13 = por %p370_p12, %p369_p11 }
  0x3f   :  { %284 = vmatpush3.bf16.msra.mxu1 %v283_v9  ;;  %p372_p0 = pnand %p371_p13, %p365_p10 }
 0x10d   :  { %v137_v11 = vpop.f32.mrb[0].mxu0 }
 0x10e   :  { %v138_v12 = vadd.f32 %v251_v10, %v137_v11  ;;  %v267_v13 = vpop.f32.mrb[1].mxu0 }
 0x110   :  { %v141_v14 = vmax.f32 %v138_v12, 0.0 }
 0x112   :  { %277 = vmatmul.mubr.msk.f32.vlgmr.msra.gmra.mrb[0].mxu1 %vm153_vm2, %v141_v14 }
 0x1e5   :  { %v223_v16 = vpop.f32.mrb[0].mxu1 }
 0x1e6   :  { %v224_v17 = vadd.f32 %v253_v15, %v223_v16  ;;  %v278_v18 = vpop.f32.mrb[1].mxu1 }
 0x1e8   :  { %v255_v19 = vmul.f32 -1.442695, %v224_v17 }
 0x1ea   :  { %294 = vpow2.f32 %v255_v19 }
 0x1f4   :  { %v295_v20 = vpop.eup %294 }
 0x1f5   :  { %v230_v21 = vadd.f32 1.0, %v295_v20 }
 0x1f7   :  { %296 = vrcp.f32 %v230_v21 }
 0x201   :  { %v297_v22 = vpop.eup %296 }
 0x202   :  { %234 = vst.msk [vmem:[#allocation8] sm:$0x3] %vm233_vm3, %v297_v22 }
 0x203   :  { %375 = shalt.err (!%p372_p0)
}
 0x204   :  { %s376_s10 = scalar_lea.hbm %s490_s5, 32 }
 0x205   :  { %p377_p1 = scmp.ne.s32.totalorder %s490_s5, %s376_s10  ;;  %p380_p2 = scmp.lt.u32.totalorder %s376_s10, %s490_s5 }
 0x207   :  { %p382_p3 = pnand %p380_p2, %p377_p1 }
 0x209   :  { %385 = shalt.err (!%p382_p3)
}
 0x20a   :  { %244 = dma.vmem_to_hbm [thread:$0]  %s242_s2, 32, %s490_s5, [#allocation4]  }
 0x20b   :  { %390 = dma.done.wait [#allocation4], 32  }
 0x20c   :  { %391 = vsyncadd [#allocation4], 4294967264 }
 0x20d   :  { %248 = vsyncpa [#allocation3], 1 }
 0x20e   :  { %249 = vsyncpa [#allocation6], 1 }
 0x20f   :  { %250 = vsyncpa [#allocation4], 1 }

</bundles_post_ra>
